<compile_context>
chip_gen: v5e
topology: v5e:2x2
jax: 0.10.0
libtpu: 0.0.40
codegen_flags: <defaults>
</compile_context>

<pallas_src>
import functools

import jax
import jax.numpy as jnp
from jax.experimental import pallas as pl
from jax.experimental.pallas import tpu as pltpu


# ---------------------------------------------------------------------------
# Kernels
# ---------------------------------------------------------------------------

def _layernorm_kernel(x_ref, a_ref, b_ref, o_ref, *, eps, features):
    """Direct path: one logical row per sublane row, features along lanes."""
    x = x_ref[...].astype(jnp.float32)

    mean = jnp.mean(x, axis=-1, keepdims=True)
    centered = x - mean
    # torch.std default: unbiased (ddof=1).
    var = jnp.sum(centered * centered, axis=-1, keepdims=True) / (features - 1)
    std = jnp.sqrt(var)

    # Exact reciprocal (approx=False) to stay within ~1e-6 of the torch
    # reference; this op is bandwidth-bound so the EUP fast path buys nothing.
    inv = pl.reciprocal(std + eps, approx=False)

    out = a_ref[...] * (centered * inv) + b_ref[...]
    o_ref[...] = out.astype(o_ref.dtype)


def _layernorm_folded_kernel(x_ref, a_ref, b_ref, mmat_ref, smat_ref, o_ref,
                             *, eps, features):
    """Lane-folded path: g = 128 // features logical rows per 128-lane row.

    Segmented reductions are expressed as matmuls with 128x128 block-diagonal
    matrices (mmat = 1/features within a segment, smat = 1 within a segment),
    so every tensor stays (tile_rows, 128): loads, compute and stores are all
    lane-dense, with no masked partial stores and no cross-lane XLU reductions.
    """
    x = x_ref[...].astype(jnp.float32)                       # (T, 128)

    hi = jax.lax.Precision.HIGHEST
    # Per-segment mean, already broadcast back across the segment's lanes.
    mean = jnp.dot(x, mmat_ref[...],
                   preferred_element_type=jnp.float32, precision=hi)
    centered = x - mean
    # Per-segment sum of squares, broadcast across the segment's lanes.
    ssq = jnp.dot(centered * centered, smat_ref[...],
                  preferred_element_type=jnp.float32, precision=hi)
    var = ssq / (features - 1)
    inv = pl.reciprocal(jnp.sqrt(var) + eps, approx=False)

    out = a_ref[...] * (centered * inv) + b_ref[...]
    o_ref[...] = out.astype(o_ref.dtype)


# ---------------------------------------------------------------------------
# Tiling / VMEM helpers
# ---------------------------------------------------------------------------

def _round_up(n, m):
    return ((n + m - 1) // m) * m


def _vmem_config():
    """Return (vmem_limit_bytes, tile_budget_bytes), generation aware."""
    cap = None
    try:
        info = pltpu.get_tpu_info()
        cap = int(getattr(info, "vmem_capacity_bytes", 0)) or None
    except Exception:
        cap = None
    if cap is None:
        # Assume the smallest generation (v7x: 64 MiB/TC) if the query fails.
        cap = 64 * 1024 * 1024
    # Leave real headroom for Mosaic internal scratch: never claim physical VMEM.
    vmem_limit = min(int(cap * 0.75), cap - 8 * 1024 * 1024)
    tile_budget = int(cap * 0.375)   # 24 MiB on v7x, 48 MiB on v5e/v6e
    return vmem_limit, tile_budget


def _pick_tile_rows(rows, width, itemsize, budget_bytes):
    """Largest row tile that fits the VMEM budget and keeps >=4 grid steps."""
    # Sublane pack: 8 rows for f32, 16 for bf16, 32 for int8/fp8.
    pack = max(8, 32 // max(itemsize, 1))

    # Per tile-row footprint: double-buffered input + output DMA tiles, plus
    # the ~two tile-sized f32 temporaries the kernel keeps live.
    per_row = 2 * 2 * width * itemsize + 2 * width * 4
    tile = budget_bytes // max(per_row, 1)

    # Bigger tiles amortize the ~0.35 us per-grid-step overhead (mem-bound op).
    tile = max(pack, min(tile, 4096))
    tile = (tile // pack) * pack

    # Keep at least ~4 grid steps so the DMA pipeline actually overlaps and the
    # "parallel" row axis can shard across both TensorCores on v7x.
    min_steps = 4
    steps_cap = _round_up((rows + min_steps - 1) // min_steps, pack)
    tile = max(pack, min(tile, steps_cap))
    return tile


# ---------------------------------------------------------------------------
# Wrapper
# ---------------------------------------------------------------------------

def layernorm_pallas(x, a_2, b_2, eps=1e-6, tile_rows=None,
                     fold_small_features=True):
    """LayerNorm over the last axis of `x`, matching the PyTorch module."""
    orig_shape = x.shape
    features = int(orig_shape[-1])
    rows = 1
    for d in orig_shape[:-1]:
        rows *= int(d)

    itemsize = jnp.dtype(x.dtype).itemsize
    vmem_limit, tile_budget = _vmem_config()

    x2 = x.reshape(rows, features)
    # Hoist the param cast out of the kernel's hot loop (tiny arrays).
    a2 = a_2.reshape(1, features).astype(jnp.float32)
    b2 = b_2.reshape(1, features).astype(jnp.float32)

    # Lane-fold small feature dims so stores are full-lane (not masked).
    fold = (fold_small_features
            and features < 128
            and 128 % features == 0
            and rows % (128 // features) == 0)

    if fold:
        g = 128 // features
        width = 128
        rows_eff = rows // g
        x2 = x2.reshape(rows_eff, width)          # contiguous => free reshape
        a2 = jnp.tile(a2, (1, g))                 # (1, 128)
        b2 = jnp.tile(b2, (1, g))
        # Block-diagonal segment matrices (exact values; 64 KiB each in VMEM).
        seg = jnp.arange(width, dtype=jnp.int32) // features
        same = seg[:, None] == seg[None, :]
        mmat = jnp.where(same, jnp.float32(1.0 / features), jnp.float32(0.0))
        smat = same.astype(jnp.float32)
    else:
        width = features
        rows_eff = rows

    if tile_rows is None:
        tile_rows = _pick_tile_rows(rows_eff, width, itemsize, tile_budget)

    # No padding copy: Pallas clamps reads of the partial last block and drops
    # out-of-range writes; each row's reduction is independent, so garbage in
    # the padded rows never contaminates valid output.
    grid = (pl.cdiv(rows_eff, tile_rows),)

    bytes_accessed = 2 * rows * features * itemsize + 2 * features * 4
    flops = 8 * rows * features
    if fold:
        flops += 2 * 2 * rows_eff * width * width   # the two segment matmuls
    cost = pl.CostEstimate(
        flops=flops,
        transcendentals=2 * rows,     # sqrt + reciprocal per logical row
        bytes_accessed=bytes_accessed,
    )

    compiler_params = pltpu.CompilerParams(
        dimension_semantics=("parallel",),
        vmem_limit_bytes=vmem_limit,
    )

    row_spec = pl.BlockSpec((tile_rows, width), lambda i: (i, 0))
    par_spec = pl.BlockSpec((1, width), lambda i: (0, 0))

    if fold:
        kernel = functools.partial(_layernorm_folded_kernel,
                                   eps=eps, features=features)
        mat_spec = pl.BlockSpec((width, width), lambda i: (0, 0))
        out = pl.pallas_call(
            kernel,
            out_shape=jax.ShapeDtypeStruct((rows_eff, width), x.dtype),
            grid_spec=pltpu.PrefetchScalarGridSpec(
                num_scalar_prefetch=0,
                grid=grid,
                in_specs=[row_spec, par_spec, par_spec, mat_spec, mat_spec],
                out_specs=row_spec,
            ),
            compiler_params=compiler_params,
            cost_estimate=cost,
        )(x2, a2, b2, mmat, smat)
    else:
        kernel = functools.partial(_layernorm_kernel,
                                   eps=eps, features=features)
        out = pl.pallas_call(
            kernel,
            out_shape=jax.ShapeDtypeStruct((rows_eff, width), x.dtype),
            grid_spec=pltpu.PrefetchScalarGridSpec(
                num_scalar_prefetch=0,
                grid=grid,
                in_specs=[row_spec, par_spec, par_spec],
                out_specs=row_spec,
            ),
            compiler_params=compiler_params,
            cost_estimate=cost,
        )(x2, a2, b2)

    return out.reshape(orig_shape)


def layernorm_ref(x, a_2, b_2, eps=1e-6):
    """Pure-JAX reference replicating the torch forward (std with ddof=1)."""
    mean = jnp.mean(x, axis=-1, keepdims=True)
    std = jnp.std(x, axis=-1, keepdims=True, ddof=1)
    return a_2 * (x - mean) / (std + eps) + b_2


if __name__ == "__main__":
    key = jax.random.PRNGKey(0)

    # Small shape consistent with the module's transformer-style usage.
    batch, seq, hidden = 2, 8, 32  # features = hidden = 32
    x = jax.random.normal(key, (batch, seq, hidden), dtype=jnp.float32)

    # nn.Parameter(torch.ones(features)) / torch.zeros(features)
    a_2 = jnp.ones((hidden,), dtype=jnp.float32)
    b_2 = jnp.zeros((hidden,), dtype=jnp.float32)
    eps = 1e-6

    # Lane-folded path (features=32 divides 128, rows divide 4).
    out = jax.block_until_ready(layernorm_pallas(x, a_2, b_2, eps=eps))
    ref = layernorm_ref(x, a_2, b_2, eps=eps)
    assert out.shape == x.shape
    assert jnp.allclose(out, ref, atol=1e-5, rtol=1e-5), "mismatch vs reference"

    # Direct (fallback) path + partial last block (rows not foldable/tileable).
    x_tail = jax.random.normal(jax.random.PRNGKey(1), (2, 5, hidden), jnp.float32)
    out_tail = jax.block_until_ready(layernorm_pallas(x_tail, a_2, b_2, eps=eps))
    ref_tail = layernorm_ref(x_tail, a_2, b_2, eps=eps)
    assert jnp.allclose(out_tail, ref_tail, atol=1e-5, rtol=1e-5), "tail mismatch"

    # Direct path with a lane-dense feature dim (multiple of 128).
    wide = 256
    xw = jax.random.normal(jax.random.PRNGKey(2), (2, 8, wide), jnp.float32)
    aw = jnp.ones((wide,), jnp.float32)
    bw = jnp.zeros((wide,), jnp.float32)
    out_w = jax.block_until_ready(layernorm_pallas(xw, aw, bw, eps=eps))
    ref_w = layernorm_ref(xw, aw, bw, eps=eps)
    assert jnp.allclose(out_w, ref_w, atol=1e-5, rtol=1e-5), "wide mismatch"

    print("KERNEL_OK")
</pallas_src>

<mosaic_0001>
module attributes {stable_mosaic.version = 11 : i64} {
  func.func @_layernorm_folded_kernel(%arg0: i32, %arg1: memref<8x128xf32, #tpu.memory_space<vmem>>, %arg2: memref<1x128xf32, #tpu.memory_space<vmem>>, %arg3: memref<1x128xf32, #tpu.memory_space<vmem>>, %arg4: memref<128x128xf32, #tpu.memory_space<vmem>>, %arg5: memref<128x128xf32, #tpu.memory_space<vmem>>, %arg6: memref<8x128xf32, #tpu.memory_space<vmem>>) attributes {dimension_semantics = [#tpu.dimension_semantics<parallel>], iteration_bounds = array<i64: 1>, scalar_prefetch = 0 : i64, scratch_operands = 0 : i64, tpu.core_type = #tpu.core_type<tc>, window_params = [{transform_indices = @transform_0, window_bounds = array<i64: 8, 128>}, {pipeline_mode = #tpu.pipeline_mode<synchronous>, transform_indices = @transform_1, window_bounds = array<i64: 1, 128>}, {pipeline_mode = #tpu.pipeline_mode<synchronous>, transform_indices = @transform_2, window_bounds = array<i64: 1, 128>}, {pipeline_mode = #tpu.pipeline_mode<synchronous>, transform_indices = @transform_3, window_bounds = array<i64: 128, 128>}, {pipeline_mode = #tpu.pipeline_mode<synchronous>, transform_indices = @transform_4, window_bounds = array<i64: 128, 128>}, {transform_indices = @transform_5, window_bounds = array<i64: 8, 128>}]} {
    %c0 = arith.constant 0 : index
    %c0_0 = arith.constant 0 : index
    %0 = vector.load %arg1[%c0, %c0_0] : memref<8x128xf32, #tpu.memory_space<vmem>>, vector<8x128xf32>
    %c0_1 = arith.constant 0 : index
    %c0_2 = arith.constant 0 : index
    %1 = vector.load %arg4[%c0_1, %c0_2] : memref<128x128xf32, #tpu.memory_space<vmem>>, vector<128x128xf32>
    %cst = arith.constant dense<0.000000e+00> : vector<8x128xf32>
    %2 = tpu.matmul %0, %1, %cst {dimension_numbers = #tpu.dot_dimension_numbers<[1], [0], [0], [1], [0, 0, 1, 1], [], []>, precision = #tpu.contract_precision<fp32>} : vector<8x128xf32>, vector<128x128xf32>, vector<8x128xf32> -> vector<8x128xf32>
    %3 = arith.subf %0, %2 : vector<8x128xf32>
    %4 = arith.mulf %3, %3 : vector<8x128xf32>
    %c0_3 = arith.constant 0 : index
    %c0_4 = arith.constant 0 : index
    %5 = vector.load %arg5[%c0_3, %c0_4] : memref<128x128xf32, #tpu.memory_space<vmem>>, vector<128x128xf32>
    %cst_5 = arith.constant dense<0.000000e+00> : vector<8x128xf32>
    %6 = tpu.matmul %4, %5, %cst_5 {dimension_numbers = #tpu.dot_dimension_numbers<[1], [0], [0], [1], [0, 0, 1, 1], [], []>, precision = #tpu.contract_precision<fp32>} : vector<8x128xf32>, vector<128x128xf32>, vector<8x128xf32> -> vector<8x128xf32>
    %cst_6 = arith.constant 3.100000e+01 : f32
    %7 = vector.broadcast %cst_6 : f32 to vector<8x128xf32>
    %8 = arith.divf %6, %7 : vector<8x128xf32>
    %9 = math.sqrt %8 : vector<8x128xf32>
    %cst_7 = arith.constant 9.99999997E-7 : f32
    %10 = vector.broadcast %cst_7 : f32 to vector<8x128xf32>
    %11 = arith.addf %9, %10 : vector<8x128xf32>
    %12 = tpu.reciprocal %11 : vector<8x128xf32> -> vector<8x128xf32>
    %c0_8 = arith.constant 0 : index
    %c0_9 = arith.constant 0 : index
    %13 = vector.load %arg2[%c0_8, %c0_9] : memref<1x128xf32, #tpu.memory_space<vmem>>, vector<1x128xf32>
    %14 = arith.mulf %3, %12 : vector<8x128xf32>
    %15 = vector.broadcast %13 : vector<1x128xf32> to vector<8x128xf32>
    %16 = arith.mulf %15, %14 : vector<8x128xf32>
    %c0_10 = arith.constant 0 : index
    %c0_11 = arith.constant 0 : index
    %17 = vector.load %arg3[%c0_10, %c0_11] : memref<1x128xf32, #tpu.memory_space<vmem>>, vector<1x128xf32>
    %18 = vector.broadcast %17 : vector<1x128xf32> to vector<8x128xf32>
    %19 = arith.addf %16, %18 : vector<8x128xf32>
    %c0_12 = arith.constant 0 : index
    %c0_13 = arith.constant 0 : index
    %20 = vector.load %arg6[%c0_12, %c0_13] : memref<8x128xf32, #tpu.memory_space<vmem>>, vector<8x128xf32>
    tpu.vector_store %arg6[%c0_12, %c0_13], %19 {strides = array<i32>} : memref<8x128xf32, #tpu.memory_space<vmem>>, vector<8x128xf32>,
    return
  }
  func.func @transform_0(%arg0: i32) -> (i32, i32) {
    %c0_i32 = arith.constant 0 : i32
    %c0_i32_0 = arith.constant 0 : i32
    return %arg0, %c0_i32 : i32, i32
  }
  func.func @transform_1(%arg0: i32) -> (i32, i32) {
    %c0_i32 = arith.constant 0 : i32
    %c0_i32_0 = arith.constant 0 : i32
    %c0_i32_1 = arith.constant 0 : i32
    return %c0_i32, %c0_i32_0 : i32, i32
  }
  func.func @transform_2(%arg0: i32) -> (i32, i32) {
    %c0_i32 = arith.constant 0 : i32
    %c0_i32_0 = arith.constant 0 : i32
    %c0_i32_1 = arith.constant 0 : i32
    return %c0_i32, %c0_i32_0 : i32, i32
  }
  func.func @transform_3(%arg0: i32) -> (i32, i32) {
    %c0_i32 = arith.constant 0 : i32
    %c0_i32_0 = arith.constant 0 : i32
    %c0_i32_1 = arith.constant 0 : i32
    return %c0_i32, %c0_i32_0 : i32, i32
  }
  func.func @transform_4(%arg0: i32) -> (i32, i32) {
    %c0_i32 = arith.constant 0 : i32
    %c0_i32_0 = arith.constant 0 : i32
    %c0_i32_1 = arith.constant 0 : i32
    return %c0_i32, %c0_i32_0 : i32, i32
  }
  func.func @transform_5(%arg0: i32) -> (i32, i32) {
    %c0_i32 = arith.constant 0 : i32
    %c0_i32_0 = arith.constant 0 : i32
    return %arg0, %c0_i32 : i32, i32
  }
}

</mosaic_0001>

<bundles_post_ra>
// kernel: tpu_custom_call.1
= control target key start
LH: loop header
LB: loop body
LE: loop exit
PB: predicated region body
PF: predicated region fallthrough
CT: control target
= control target key end

     0   :  { %10 = vsyncpa [#allocation3], 0  ;;  %s1573_s0 = inlined_call_operand.hbm [shape: f32[4,128], index: 0, kind: input, shape index: {}]   ;;  %s1574_s1 = inlined_call_operand.hbm [shape: f32[1,128], index: 1, kind: input, shape index: {}]   ;;  %s1575_s2 = inlined_call_operand.vmem [shape: f32[1,128], index: 2, kind: input, shape index: {}]   ;;  %s1576_s3 = inlined_call_operand.hbm [shape: f32[128,128], index: 3, kind: input, shape index: {}]   ;;  %s1577_s4 = inlined_call_operand.hbm [shape: f32[128,128], index: 4, kind: input, shape index: {}]   ;;  %s1578_s5 = inlined_call_operand.hbm [shape: f32[4,128], index: 5, kind: output, shape index: {}]  }
   0x1   :  { %11 = vsyncpa [#allocation6], 0 }
   0x2   :  { %12 = vsyncpa [#allocation9], 0 }
   0x3   :  { %13 = vsyncpa [#allocation4], 0  ;;  %s32_s20 = sshll.u32 %s1574_s1, 4  ;;  %s33_s20 = int_to_ptr.hbm [resolvable:$true] %s32_s20 }
   0x4   :  { %17 = vsyncadd [#allocation3], 64  ;;  %s1013_s21 = smov [#allocation5]   ;;  %s18_s25 = sshll.u32 %s1573_s0, 4  ;;  %s19_s25 = int_to_ptr.hbm [resolvable:$true] %s18_s25 }
   0x5   :  { %s34_s22 = sshll.u32 %s1013_s21, 4  ;;  %s1014_s26 = smov [#allocation2]   ;;  %s35_s22 = int_to_ptr.vmem [resolvable:$true] %s34_s22 }
   0x6   :  { %37 = dma.hbm_to_vmem [thread:$0]  %s33_s20, 16, %s35_s22, [#allocation6]  }
   0x7   :  { %s20_s27 = sshll.u32 %s1014_s26, 4  ;;  %s1015_s28 = smov 64   ;;  %s21_s27 = int_to_ptr.vmem [resolvable:$true] %s20_s27 }
   0x8   :  { %s1016_s29 = smov 4   ;;  %s44_s6 = sshll.u32 %s1576_s3, 4  ;;  %s45_s6 = int_to_ptr.hbm [resolvable:$true] %s44_s6 }
   0x9   :  { %26 = dma.hbm_to_vmem [thread:$0]  %s19_s25, 64, %s21_s27, [#allocation3], %s1015_s28, %s1015_s28, %s1016_s29  }
   0xa   :  { %s1017_s7 = smov [#allocation7]   ;;  %s57_s10 = sshll.u32 %s1577_s4, 4  ;;  %s58_s10 = int_to_ptr.hbm [resolvable:$true] %s57_s10 }
   0xb   :  { %s46_s8 = sshll.u32 %s1017_s7, 4  ;;  %s1018_s11 = smov 128   ;;  %s47_s8 = int_to_ptr.vmem [resolvable:$true] %s46_s8 }
   0xc   :  { %s1019_s12 = smov 8   ;;  %s1020_s13 = smov [#allocation8]  }
   0xd   :  { %52 = dma.hbm_to_vmem [thread:$0]  %s45_s6, 2048, %s47_s8, [#allocation6], %s1018_s11, %s1018_s11, %s1019_s12  }
   0xe   :  { %s59_s14 = sshll.u32 %s1020_s13, 4  ;;  %s60_s14 = int_to_ptr.vmem [resolvable:$true] %s59_s14 }
   0xf   :  { %65 = dma.hbm_to_vmem [thread:$0]  %s58_s10, 2048, %s60_s14, [#allocation9], %s1018_s11, %s1018_s11, %s1019_s12  }
  0x10   :  { %1005 = dma.done.wait [#allocation3], 128  }
  0x11   :  { %1006 = vsyncadd [#allocation3], 4294967168 }
  0x12   :  { %1007 = dma.done.wait [#allocation6], 2064  }
  0x13   :  { %1008 = vsyncadd [#allocation6], 4294965232 }
  0x14   :  { %1009 = dma.done.wait [#allocation9], 2048  }
  0x15   :  { %1010 = vsyncadd [#allocation9], 4294965248  ;;  %v98_v0 = vld [vmem:[#allocation7 + $0x78] sm:$0xff]  ;;  %v97_v1 = vld [vmem:[#allocation7 + $0x70] sm:$0xff] }
  0x16   :  { %v96_v2 = vld [vmem:[#allocation7 + $0x68] sm:$0xff]  ;;  %v1068_v3 = vand.u32 4294901760, %v98_v0  ;;  %v1070_v4 = vand.u32 4294901760, %v97_v1  ;;  %v95_v6 = vld [vmem:[#allocation7 + $0x60] sm:$0xff]  ;;  %v94_v7 = vld [vmem:[#allocation7 + $0x58] sm:$0xff] }
  0x17   :  { %v1072_v5 = vand.u32 4294901760, %v96_v2  ;;  %v93_v8 = vld [vmem:[#allocation7 + $0x50] sm:$0xff]  ;;  %v1074_v9 = vand.u32 4294901760, %v95_v6  ;;  %v1076_v10 = vand.u32 4294901760, %v94_v7  ;;  %v92_v12 = vld [vmem:[#allocation7 + $0x48] sm:$0xff]  ;;  %v91_v13 = vld [vmem:[#allocation7 + $0x40] sm:$0xff] }
  0x18   :  { %v1078_v11 = vand.u32 4294901760, %v93_v8  ;;  %100 = vmatpush.msra.mxu0 %v1068_v3  ;;  %v1082_v14 = vsub.f32 %v98_v0, %v1068_v3  ;;  %v1085_v15 = vsub.f32 %v97_v1, %v1070_v4  ;;  %v1090_v17 = vand.u32 4294901760, %v92_v12  ;;  %v90_v18 = vld [vmem:[#allocation7 + $0x38] sm:$0xff]  ;;  %296 = vmatpush.msra.mxu3 %v1068_v3  ;;  %v89_v26 = vld [vmem:[#allocation7 + $0x30] sm:$0xff]  ;;  %v88_v36 = vld [vmem:[#allocation7 + $0x28] sm:$0xff] }
  0x19   :  { %v1088_v16 = vsub.f32 %v96_v2, %v1072_v5  ;;  %v1094_v19 = vsub.f32 %v95_v6, %v1074_v9  ;;  %v1097_v20 = vsub.f32 %v94_v7, %v1076_v10  ;;  %v1106_v25 = vand.u32 4294901760, %v91_v13  ;;  %v87_v42 = vld [vmem:[#allocation7 + $0x20] sm:$0xff]  ;;  %v86_v47 = vld [vmem:[#allocation7 + $0x18] sm:$0xff]  ;;  %v85_v55 = vld [vmem:[#allocation7 + $0x10] sm:$0xff] }
  0x1a   :  { %v1100_v21 = vsub.f32 %v93_v8, %v1078_v11  ;;  %102 = vmatpush.msra.mxu0 %v1070_v4  ;;  %v142_v22 = vand.u32 4294901760, %v1082_v14  ;;  %v148_v23 = vand.u32 4294901760, %v1085_v15  ;;  %243 = vmatpush.msra.mxu2 %v1082_v14  ;;  %v1110_v28 = vand.u32 4294901760, %v90_v18  ;;  %v84_v60 = vld [vmem:[#allocation7 + $0x8] sm:$0xff]  ;;  %v83_v1 = vld [vmem:[#allocation7] sm:$0xff]  ;;  %v1192_v7 = vld [vmem:[#allocation2] sm:$0xff] }
  0x1b   :  { %v154_v24 = vand.u32 4294901760, %v1088_v16  ;;  %v160_v27 = vand.u32 4294901760, %v1094_v19  ;;  %v1113_v29 = vsub.f32 %v92_v12, %v1090_v17  ;;  %298 = vmatpush.msra.mxu3 %v1070_v4  ;;  %v166_v33 = vand.u32 4294901760, %v1097_v20 }
  0x1c   :  { %104 = vmatpush.msra.mxu0 %v1072_v5  ;;  %v143_v30 = vsub.f32 %v1082_v14, %v142_v22  ;;  %v149_v31 = vsub.f32 %v1085_v15, %v148_v23  ;;  %246 = vmatpush.msra.mxu2 %v1085_v15  ;;  %v172_v34 = vand.u32 4294901760, %v1100_v21  ;;  %v1129_v35 = vand.u32 4294901760, %v89_v26  ;;  %v457_v14 = vld [vmem:[#allocation8 + $0x78] sm:$0xff] }
  0x1d   :  { %v155_v32 = vsub.f32 %v1088_v16, %v154_v24  ;;  %300 = vmatpush.msra.mxu3 %v1072_v5  ;;  %v161_v39 = vsub.f32 %v1094_v19, %v160_v27  ;;  %v1137_v40 = vsub.f32 %v91_v13, %v1106_v25  ;;  %v178_v41 = vand.u32 4294901760, %v1113_v29 }
  0x1e   :  { %v144_v37 = vand.u32 4294901760, %v143_v30  ;;  %106 = vmatpush.msra.mxu0 %v1074_v9  ;;  %v150_v38 = vand.u32 4294901760, %v149_v31  ;;  %249 = vmatpush.msra.mxu2 %v1088_v16  ;;  %v167_v44 = vsub.f32 %v1097_v20, %v166_v33  ;;  %v1146_v45 = vand.u32 4294901760, %v88_v36 }
  0x1f   :  { %302 = vmatpush.msra.mxu3 %v1074_v9  ;;  %v156_v43 = vand.u32 4294901760, %v155_v32  ;;  %v1149_v46 = vsub.f32 %v90_v18, %v1110_v28  ;;  %v173_v48 = vsub.f32 %v1100_v21, %v172_v34  ;;  %v162_v49 = vand.u32 4294901760, %v161_v39 }
  0x20   :  { %145 = vmatpush.msra.mxu1 %v144_v37  ;;  %108 = vmatpush.msra.mxu0 %v1076_v10  ;;  %v184_v50 = vand.u32 4294901760, %v1137_v40  ;;  %v1158_v51 = vand.u32 4294901760, %v87_v42  ;;  %v1161_v52 = vsub.f32 %v89_v26, %v1129_v35  ;;  %v179_v53 = vsub.f32 %v1113_v29, %v178_v41 }
  0x21   :  { %252 = vmatpush.msra.mxu2 %v1094_v19  ;;  %304 = vmatpush.msra.mxu3 %v1076_v10  ;;  %v1166_v54 = vand.u32 4294901760, %v86_v47  ;;  %v168_v56 = vand.u32 4294901760, %v167_v44  ;;  %v190_v57 = vand.u32 4294901760, %v1149_v46  ;;  %v1173_v58 = vsub.f32 %v88_v36, %v1146_v45 }
  0x22   :  { %151 = vmatpush.msra.mxu1 %v150_v38  ;;  %110 = vmatpush.msra.mxu0 %v1078_v11  ;;  %v174_v59 = vand.u32 4294901760, %v173_v48  ;;  %v185_v61 = vsub.f32 %v1137_v40, %v184_v50  ;;  %v196_v62 = vand.u32 4294901760, %v1161_v52  ;;  %v1182_v63 = vand.u32 4294901760, %v85_v55 }
  0x23   :  { %255 = vmatpush.msra.mxu2 %v1097_v20  ;;  %306 = vmatpush.msra.mxu3 %v1078_v11  ;;  %v1185_v0 = vsub.f32 %v87_v42, %v1158_v51  ;;  %v180_v2 = vand.u32 4294901760, %v179_v53  ;;  %v1188_v6 = vsub.f32 %v86_v47, %v1166_v54  ;;  %v191_v8 = vsub.f32 %v1149_v46, %v190_v57  ;;  %v450_v20 = vld [vmem:[#allocation8 + $0x40] sm:$0xff] }
  0x24   :  { %157 = vmatpush.msra.mxu1 %v156_v43  ;;  %112 = vmatpush.msra.mxu0 %v1090_v17  ;;  %v202_v12 = vand.u32 4294901760, %v1173_v58  ;;  %v1199_v13 = vand.u32 4294901760, %v84_v60  ;;  %v1202_v18 = vand.u32 4294901760, %v1192_v7  ;;  %v1204_v26 = vand.u32 4294901760, %v83_v1 }
  0x25   :  { %258 = vmatpush.msra.mxu2 %v1100_v21  ;;  %308 = vmatpush.msra.mxu3 %v1090_v17  ;;  %v186_v30 = vand.u32 4294901760, %v185_v61  ;;  %v197_v31 = vsub.f32 %v1161_v52, %v196_v62  ;;  %v208_v32 = vand.u32 4294901760, %v1185_v0  ;;  %v1214_v36 = vsub.f32 %v85_v55, %v1182_v63 }
  0x26   :  { %163 = vmatpush.msra.mxu1 %v162_v49  ;;  %114 = vmatpush.msra.mxu0 %v1106_v25  ;;  %v214_v37 = vand.u32 4294901760, %v1188_v6  ;;  %v192_v38 = vand.u32 4294901760, %v191_v8  ;;  %v203_v39 = vsub.f32 %v1173_v58, %v202_v12  ;;  %v1224_v42 = vsub.f32 %v84_v60, %v1199_v13 }
  0x27   :  { %261 = vmatpush.msra.mxu2 %v1113_v29  ;;  %310 = vmatpush.msra.mxu3 %v1106_v25  ;;  %v132_v43 = vsub.f32 %v1192_v7, %v1202_v18  ;;  %v198_v44 = vand.u32 4294901760, %v197_v31  ;;  %v209_v47 = vsub.f32 %v1185_v0, %v208_v32  ;;  %v220_v48 = vand.u32 4294901760, %v1214_v36 }
  0x28   :  { %169 = vmatpush.msra.mxu1 %v168_v56  ;;  %116 = vmatpush.msra.mxu0 %v1110_v28  ;;  %v1236_v49 = vsub.f32 %v83_v1, %v1204_v26  ;;  %v204_v53 = vand.u32 4294901760, %v203_v39  ;;  %v215_v55 = vsub.f32 %v1188_v6, %v214_v37  ;;  %v226_v56 = vand.u32 4294901760, %v1224_v42 }
  0x29   :  { %264 = vmatpush.msra.mxu2 %v1137_v40  ;;  %312 = vmatpush.msra.mxu3 %v1110_v28  ;;  %v210_v60 = vand.u32 4294901760, %v209_v47  ;;  %v221_v61 = vsub.f32 %v1214_v36, %v220_v48  ;;  %v1278_v15 = vand.u32 4294901760, %v457_v14  ;;  %v449_v40 = vld [vmem:[#allocation8 + $0x38] sm:$0xff] }
  0x2a   :  { %175 = vmatpush.msra.mxu1 %v174_v59  ;;  %118 = vmatpush.msra.mxu0 %v1129_v35  ;;  %v133_v59 = vand.u32 4294901760, %v132_v43  ;;  %v232_v1 = vand.u32 4294901760, %v1236_v49  ;;  %v227_v8 = vsub.f32 %v1224_v42, %v226_v56 }
  0x2b   :  { %267 = vmatpush.msra.mxu2 %v1149_v46  ;;  %314 = vmatpush.msra.mxu3 %v1129_v35  ;;  %v222_v31 = vand.u32 4294901760, %v221_v61  ;;  %v1357_v46 = vand.u32 4294901760, %v449_v40 }
  0x2c   :  { %181 = vmatpush.msra.mxu1 %v180_v2  ;;  %120 = vmatpush.msra.mxu0 %v1146_v45  ;;  %v216_v2 = vand.u32 4294901760, %v215_v55  ;;  %v228_v39 = vand.u32 4294901760, %v227_v8  ;;  %v452_v55 = vld [vmem:[#allocation8 + $0x50] sm:$0xff] }
  0x2d   :  { %270 = vmatpush.msra.mxu2 %v1161_v52  ;;  %316 = vmatpush.msra.mxu3 %v1146_v45  ;;  %v1372_v52 = vsub.f32 %v449_v40, %v1357_v46 }
  0x2e   :  { %187 = vmatpush.msra.mxu1 %v186_v30  ;;  %122 = vmatpush.msra.mxu0 %v1158_v51  ;;  %v134_v30 = vsub.f32 %v132_v43, %v133_v59 }
  0x2f   :  { %273 = vmatpush.msra.mxu2 %v1173_v58  ;;  %318 = vmatpush.msra.mxu3 %v1158_v51 }
  0x30   :  { %193 = vmatpush.msra.mxu1 %v192_v38  ;;  %124 = vmatpush.msra.mxu0 %v1166_v54  ;;  %v233_v38 = vsub.f32 %v1236_v49, %v232_v1 }
  0x31   :  { %276 = vmatpush.msra.mxu2 %v1185_v0  ;;  %320 = vmatpush.msra.mxu3 %v1166_v54  ;;  %v443_v0 = vld [vmem:[#allocation8 + $0x8] sm:$0xff] }
  0x32   :  { %199 = vmatpush.msra.mxu1 %v198_v44  ;;  %126 = vmatpush.msra.mxu0 %v1182_v63  ;;  %v135_v44 = vand.u32 4294901760, %v134_v30  ;;  %v234_v47 = vand.u32 4294901760, %v233_v38 }
  0x33   :  { %279 = vmatpush.msra.mxu2 %v1188_v6  ;;  %322 = vmatpush.msra.mxu3 %v1182_v63  ;;  %v442_v6 = vld [vmem:[#allocation8] sm:$0xff] }
  0x34   :  { %205 = vmatpush.msra.mxu1 %v204_v53  ;;  %128 = vmatpush.msra.mxu0 %v1199_v13  ;;  %v455_v53 = vld [vmem:[#allocation8 + $0x68] sm:$0xff] }
  0x35   :  { %282 = vmatpush.msra.mxu2 %v1214_v36  ;;  %324 = vmatpush.msra.mxu3 %v1199_v13  ;;  %v1282_v16 = vand.u32 4294901760, %v455_v53 }
  0x36   :  { %211 = vmatpush.msra.mxu1 %v210_v60  ;;  %130 = vmatpush.msra.mxu0 %v1204_v26 }
  0x37   :  { %285 = vmatpush.msra.mxu2 %v1224_v42  ;;  %326 = vmatpush.msra.mxu3 %v1204_v26  ;;  %v1301_v61 = vsub.f32 %v455_v53, %v1282_v16 }
  0x38   :  { %337 = vmatpush.msrb.mxu0 %v142_v22  ;;  %217 = vmatpush.msra.mxu1 %v216_v2  ;;  %v456_v22 = vld [vmem:[#allocation8 + $0x70] sm:$0xff] }
  0x39   :  { %288 = vmatpush.msra.mxu2 %v1236_v49  ;;  %330 = vmatmul.f32.vlgmr.msra.gmra.mxu3 %v133_v59  ;;  %v1289_v59 = vand.u32 4294901760, %v452_v55  ;;  %v513_v30 = vand.u32 4294901760, %v1301_v61 }
  0x3a   :  { %341 = vmatpush.msrb.mxu0 %v148_v23  ;;  %223 = vmatpush.msra.mxu1 %v222_v31  ;;  %v1280_v23 = vand.u32 4294901760, %v456_v22  ;;  %v1318_v31 = vand.u32 4294901760, %v450_v20 }
  0x3b   :  { %291 = vmatmul.f32.vlgmr.msra.gmra.mxu2 %v132_v43  ;;  %136 = vmatmul.f32.vlgmr.msra.gmra.mxu0 %v135_v44  ;;  %v453_v43 = vld [vmem:[#allocation8 + $0x58] sm:$0xff]  ;;  %v514_v44 = vsub.f32 %v1301_v61, %v513_v30 }
  0x3c   :  { %345 = vmatpush.msrb.mxu0 %v154_v24  ;;  %229 = vmatpush.msra.mxu1 %v228_v39  ;;  %v454_v24 = vld [vmem:[#allocation8 + $0x60] sm:$0xff]  ;;  %v1298_v60 = vsub.f32 %v456_v22, %v1280_v23  ;;  %v1323_v39 = vsub.f32 %v452_v55, %v1289_v59  ;;  %v447_v22 = vld [vmem:[#allocation8 + $0x28] sm:$0xff] }
  0x3d   :  { %v1285_v19 = vand.u32 4294901760, %v454_v24  ;;  %459 = vmatpush.msrb.mxu2 %v1278_v15  ;;  %v446_v55 = vld [vmem:[#allocation8 + $0x20] sm:$0xff] }
  0x3e   :  { %349 = vmatpush.msrb.mxu0 %v160_v27  ;;  %235 = vmatpush.msra.mxu1 %v234_v47  ;;  %v1287_v27 = vand.u32 4294901760, %v453_v43 }
  0x3f   :  { %237 = vmatmul.f32.vlgmr.msra.gmra.mxu1 %v1202_v18  ;;  %v1306_v8 = vsub.f32 %v454_v24, %v1285_v19  ;;  %461 = vmatpush.msrb.mxu2 %v1280_v23 }
  0x40   :  { %404 = vmatpush.msrb.mxu1 %v1068_v3  ;;  %353 = vmatpush.msrb.mxu0 %v166_v33  ;;  %v451_v3 = vld [vmem:[#allocation8 + $0x48] sm:$0xff]  ;;  %v1295_v33 = vsub.f32 %v457_v14, %v1278_v15  ;;  %v1346_v14 = vsub.f32 %v450_v20, %v1318_v31 }
  0x41   :  { %v1303_v2 = vand.u32 4294901760, %v451_v3  ;;  %v519_v38 = vand.u32 4294901760, %v1306_v8  ;;  %463 = vmatpush.msrb.mxu2 %v1282_v16 }
  0x42   :  { %406 = vmatpush.msrb.mxu1 %v1070_v4  ;;  %357 = vmatpush.msrb.mxu0 %v172_v34  ;;  %v1310_v4 = vsub.f32 %v453_v43, %v1287_v27  ;;  %v501_v21 = vand.u32 4294901760, %v1295_v33  ;;  %v507_v34 = vand.u32 4294901760, %v1298_v60  ;;  %v531_v43 = vand.u32 4294901760, %v1323_v39 }
  0x43   :  { %v520_v24 = vsub.f32 %v1306_v8, %v519_v38  ;;  %465 = vmatpush.msrb.mxu2 %v1285_v19 }
  0x44   :  { %408 = vmatpush.msrb.mxu1 %v1072_v5  ;;  %361 = vmatpush.msrb.mxu0 %v178_v41  ;;  %v502_v5 = vsub.f32 %v1295_v33, %v501_v21  ;;  %v508_v29 = vsub.f32 %v1298_v60, %v507_v34  ;;  %v1335_v41 = vsub.f32 %v451_v3, %v1303_v2  ;;  %v515_v3 = vand.u32 4294901760, %v514_v44 }
  0x45   :  { %467 = vmatpush.msrb.mxu2 %v1287_v27  ;;  %v532_v44 = vsub.f32 %v1323_v39, %v531_v43 }
  0x46   :  { %410 = vmatpush.msrb.mxu1 %v1074_v9  ;;  %365 = vmatpush.msrb.mxu0 %v184_v50  ;;  %v525_v9 = vand.u32 4294901760, %v1310_v4  ;;  %v448_v50 = vld [vmem:[#allocation8 + $0x30] sm:$0xff]  ;;  %v503_v47 = vand.u32 4294901760, %v502_v5  ;;  %v509_v53 = vand.u32 4294901760, %v508_v29  ;;  %v1365_v5 = vand.u32 4294901760, %v447_v22 }
  0x47   :  { %v521_v29 = vand.u32 4294901760, %v520_v24  ;;  %469 = vmatpush.msrb.mxu2 %v1289_v59 }
  0x48   :  { %412 = vmatpush.msrb.mxu1 %v1076_v10  ;;  %369 = vmatpush.msrb.mxu0 %v190_v57  ;;  %v537_v10 = vand.u32 4294901760, %v1335_v41  ;;  %v1359_v57 = vand.u32 4294901760, %v448_v50  ;;  %v526_v20 = vsub.f32 %v1310_v4, %v525_v9 }
  0x49   :  { %504 = vmatpush.msrb.mxu3 %v503_v47  ;;  %471 = vmatpush.msrb.mxu2 %v1303_v2 }
  0x4a   :  { %414 = vmatpush.msrb.mxu1 %v1078_v11  ;;  %373 = vmatpush.msrb.mxu0 %v196_v62  ;;  %v543_v11 = vand.u32 4294901760, %v1346_v14  ;;  %v445_v62 = vld [vmem:[#allocation8 + $0x18] sm:$0xff]  ;;  %v1379_v47 = vsub.f32 %v448_v50, %v1359_v57  ;;  %v538_v58 = vsub.f32 %v1335_v41, %v537_v10  ;;  %v527_v40 = vand.u32 4294901760, %v526_v20 }
  0x4b   :  { %510 = vmatpush.msrb.mxu3 %v509_v53  ;;  %v549_v53 = vand.u32 4294901760, %v1372_v52  ;;  %v1392_v50 = vsub.f32 %v447_v22, %v1365_v5  ;;  %v1394_v24 = vand.u32 4294901760, %v445_v62  ;;  %473 = vmatpush.msrb.mxu2 %v1318_v31 }
  0x4c   :  { %416 = vmatpush.msrb.mxu1 %v1090_v17  ;;  %377 = vmatpush.msrb.mxu0 %v202_v12  ;;  %v1381_v17 = vand.u32 4294901760, %v446_v55  ;;  %v444_v12 = vld [vmem:[#allocation8 + $0x10] sm:$0xff] }
  0x4d   :  { %516 = vmatpush.msrb.mxu3 %v515_v3  ;;  %v555_v3 = vand.u32 4294901760, %v1379_v47  ;;  %v1407_v20 = vand.u32 4294901760, %v444_v12  ;;  %475 = vmatpush.msrb.mxu2 %v1357_v46 }
  0x4e   :  { %418 = vmatpush.msrb.mxu1 %v1106_v25  ;;  %381 = vmatpush.msrb.mxu0 %v208_v32  ;;  %v544_v25 = vsub.f32 %v1346_v14, %v543_v11  ;;  %v533_v32 = vand.u32 4294901760, %v532_v44  ;;  %v1405_v22 = vsub.f32 %v446_v55, %v1381_v17  ;;  %v1418_v55 = vsub.f32 %v445_v62, %v1394_v24 }
  0x4f   :  { %522 = vmatpush.msrb.mxu3 %v521_v29  ;;  %v561_v29 = vand.u32 4294901760, %v1392_v50  ;;  %v1420_v44 = vand.u32 4294901760, %v443_v0  ;;  %v556_v36 = vsub.f32 %v1379_v47, %v555_v3  ;;  %477 = vmatpush.msrb.mxu2 %v1359_v57  ;;  %v1431_v62 = vsub.f32 %v444_v12, %v1407_v20 }
  0x50   :  { %420 = vmatpush.msrb.mxu1 %v1110_v28  ;;  %385 = vmatpush.msrb.mxu0 %v214_v37  ;;  %v539_v28 = vand.u32 4294901760, %v538_v58  ;;  %v550_v37 = vsub.f32 %v1372_v52, %v549_v53  ;;  %v1433_v58 = vand.u32 4294901760, %v442_v6 }
  0x51   :  { %528 = vmatpush.msrb.mxu3 %v527_v40  ;;  %v562_v42 = vsub.f32 %v1392_v50, %v561_v29  ;;  %v1444_v12 = vsub.f32 %v443_v0, %v1420_v44  ;;  %479 = vmatpush.msrb.mxu2 %v1365_v5 }
  0x52   :  { %422 = vmatpush.msrb.mxu1 %v1129_v35  ;;  %389 = vmatpush.msrb.mxu0 %v220_v48  ;;  %v545_v35 = vand.u32 4294901760, %v544_v25  ;;  %v567_v48 = vand.u32 4294901760, %v1405_v22  ;;  %v1454_v40 = vsub.f32 %v442_v6, %v1433_v58 }
  0x53   :  { %534 = vmatpush.msrb.mxu3 %v533_v32  ;;  %v585_v0 = vand.u32 4294901760, %v1444_v12  ;;  %481 = vmatpush.msrb.mxu2 %v1381_v17 }
  0x54   :  { %424 = vmatpush.msrb.mxu1 %v1146_v45  ;;  %393 = vmatpush.msrb.mxu0 %v226_v56  ;;  %v551_v45 = vand.u32 4294901760, %v550_v37  ;;  %v573_v56 = vand.u32 4294901760, %v1418_v55  ;;  %v568_v49 = vsub.f32 %v1405_v22, %v567_v48 }
  0x55   :  { %540 = vmatpush.msrb.mxu3 %v539_v28  ;;  %v591_v28 = vand.u32 4294901760, %v1454_v40  ;;  %483 = vmatpush.msrb.mxu2 %v1394_v24  ;;  %v586_v6 = vsub.f32 %v1444_v12, %v585_v0 }
  0x56   :  { %426 = vmatpush.msrb.mxu1 %v1158_v51  ;;  %397 = vmatpush.msrb.mxu0 %v232_v1  ;;  %v557_v51 = vand.u32 4294901760, %v556_v36  ;;  %v579_v1 = vand.u32 4294901760, %v1431_v62  ;;  %v574_v25 = vsub.f32 %v1418_v55, %v573_v56  ;;  %v569_v32 = vand.u32 4294901760, %v568_v49 }
  0x57   :  { %399 = vmatmul.f32.vlgmr.msrb.gmra.mxu0 %v1202_v18  ;;  %546 = vmatpush.msrb.mxu3 %v545_v35 }
  0x58   :  { %428 = vmatpush.msrb.mxu1 %v1166_v54  ;;  %602 = vmatpush.msra.mxu0 %v1295_v33  ;;  %v563_v54 = vand.u32 4294901760, %v562_v42 }
  0x59   :  { %552 = vmatpush.msrb.mxu3 %v551_v45  ;;  %485 = vmatpush.msrb.mxu2 %v1407_v20 }
  0x5a   :  { %430 = vmatpush.msrb.mxu1 %v1182_v63  ;;  %605 = vmatpush.msra.mxu0 %v1298_v60  ;;  %v580_v63 = vsub.f32 %v1431_v62, %v579_v1 }
  0x5b   :  { %558 = vmatpush.msrb.mxu3 %v557_v51  ;;  %487 = vmatpush.msrb.mxu2 %v1420_v44 }
  0x5c   :  { %432 = vmatpush.msrb.mxu1 %v1199_v13  ;;  %608 = vmatpush.msra.mxu0 %v1301_v61  ;;  %v575_v13 = vand.u32 4294901760, %v574_v25  ;;  %v581_v37 = vand.u32 4294901760, %v580_v63 }
  0x5d   :  { %564 = vmatpush.msrb.mxu3 %v563_v54  ;;  %489 = vmatpush.msrb.mxu2 %v1433_v58 }
  0x5e   :  { %434 = vmatpush.msrb.mxu1 %v1204_v26  ;;  %611 = vmatpush.msra.mxu0 %v1306_v8  ;;  %v592_v26 = vsub.f32 %v1454_v40, %v591_v28 }
  0x5f   :  { %436 = vmatmul.f32.vlgmr.msrb.gmra.mxu1 %v1202_v18  ;;  %570 = vmatpush.msrb.mxu3 %v569_v32  ;;  %v587_v18 = vand.u32 4294901760, %v586_v6 }
  0x60   :  { %655 = vmatpush.msra.mxu1 %v1278_v15  ;;  %614 = vmatpush.msra.mxu0 %v1310_v4  ;;  %v593_v35 = vand.u32 4294901760, %v592_v26 }
  0x61   :  { %576 = vmatpush.msrb.mxu3 %v575_v13  ;;  %696 = vmatpush.msra.mxu2 %v501_v21 }
  0x62   :  { %657 = vmatpush.msra.mxu1 %v1280_v23  ;;  %617 = vmatpush.msra.mxu0 %v1323_v39 }
  0x63   :  { %582 = vmatpush.msrb.mxu3 %v581_v37  ;;  %700 = vmatpush.msra.mxu2 %v507_v34  ;;  %v878_v37 = vld [vmem:[%s1575_s2] ss:$0 sm:$0xff] }
  0x64   :  { %659 = vmatpush.msra.mxu1 %v1282_v16  ;;  %620 = vmatpush.msra.mxu0 %v1335_v41  ;;  %v1021_v41 = vmov 31.0  }
  0x65   :  { %588 = vmatpush.msrb.mxu3 %v587_v18  ;;  %704 = vmatpush.msra.mxu2 %v513_v30  ;;  %879 = vrcp.f32 %v1021_v41 }
  0x66   :  { %661 = vmatpush.msra.mxu1 %v1285_v19  ;;  %623 = vmatpush.msra.mxu0 %v1346_v14 }
  0x67   :  { %594 = vmatpush.msrb.mxu3 %v593_v35  ;;  %708 = vmatpush.msra.mxu2 %v519_v38 }
  0x68   :  { %663 = vmatpush.msra.mxu1 %v1287_v27  ;;  %626 = vmatpush.msra.mxu0 %v1372_v52 }
  0x69   :  { %763 = vmatpush.msra.mxu3 %v1278_v15  ;;  %712 = vmatpush.msra.mxu2 %v525_v9 }
  0x6a   :  { %665 = vmatpush.msra.mxu1 %v1289_v59  ;;  %629 = vmatpush.msra.mxu0 %v1379_v47 }
  0x6b   :  { %765 = vmatpush.msra.mxu3 %v1280_v23  ;;  %716 = vmatpush.msra.mxu2 %v531_v43  ;;  %v880_v9 = vpop.eup %879 }
  0x6c   :  { %667 = vmatpush.msra.mxu1 %v1303_v2  ;;  %632 = vmatpush.msra.mxu0 %v1392_v50  ;;  %v800_v14 = vmul.f32 31.0, %v880_v9  ;;  %vm804_vm0 = vweird.f32 %v880_v9 }
  0x6d   :  { %767 = vmatpush.msra.mxu3 %v1282_v16  ;;  %720 = vmatpush.msra.mxu2 %v537_v10 }
  0x6e   :  { %669 = vmatpush.msra.mxu1 %v1318_v31  ;;  %635 = vmatpush.msra.mxu0 %v1405_v22 }
  0x6f   :  { %769 = vmatpush.msra.mxu3 %v1285_v19  ;;  %724 = vmatpush.msra.mxu2 %v543_v11 }
  0x70   :  { %671 = vmatpush.msra.mxu1 %v1357_v46  ;;  %638 = vmatpush.msra.mxu0 %v1418_v55 }
  0x71   :  { %771 = vmatpush.msra.mxu3 %v1287_v27  ;;  %728 = vmatpush.msra.mxu2 %v549_v53 }
  0x72   :  { %673 = vmatpush.msra.mxu1 %v1359_v57  ;;  %641 = vmatpush.msra.mxu0 %v1431_v62 }
  0x73   :  { %773 = vmatpush.msra.mxu3 %v1289_v59  ;;  %732 = vmatpush.msra.mxu2 %v555_v3 }
  0x74   :  { %675 = vmatpush.msra.mxu1 %v1365_v5  ;;  %644 = vmatpush.msra.mxu0 %v1444_v12 }
  0x75   :  { %775 = vmatpush.msra.mxu3 %v1303_v2  ;;  %736 = vmatpush.msra.mxu2 %v561_v29 }
  0x76   :  { %677 = vmatpush.msra.mxu1 %v1381_v17  ;;  %647 = vmatpush.msra.mxu0 %v1454_v40 }
  0x77   :  { %777 = vmatpush.msra.mxu3 %v1318_v31  ;;  %740 = vmatpush.msra.mxu2 %v567_v48 }
  0x78   :  { %679 = vmatpush.msra.mxu1 %v1394_v24 }
  0x79   :  { %779 = vmatpush.msra.mxu3 %v1357_v46  ;;  %744 = vmatpush.msra.mxu2 %v573_v56 }
  0x7a   :  { %681 = vmatpush.msra.mxu1 %v1407_v20 }
  0x7b   :  { %781 = vmatpush.msra.mxu3 %v1359_v57  ;;  %748 = vmatpush.msra.mxu2 %v579_v1 }
  0x7c   :  { %683 = vmatpush.msra.mxu1 %v1420_v44 }
  0x7d   :  { %783 = vmatpush.msra.mxu3 %v1365_v5  ;;  %752 = vmatpush.msra.mxu2 %v585_v0 }
  0x7e   :  { %685 = vmatpush.msra.mxu1 %v1433_v58 }
  0x7f   :  { %785 = vmatpush.msra.mxu3 %v1381_v17  ;;  %756 = vmatpush.msra.mxu2 %v591_v28  ;;  %v877_v28 = vld [vmem:[#allocation5] ss:$0 sm:$0xff] }
  0x81   :  { %787 = vmatpush.msra.mxu3 %v1394_v24 }
  0x83   :  { %789 = vmatpush.msra.mxu3 %v1407_v20 }
  0x85   :  { %791 = vmatpush.msra.mxu3 %v1420_v44 }
  0x87   :  { %793 = vmatpush.msra.mxu3 %v1433_v58 }
  0xb8   :  { %v137_v23 = vpop.f32.mrf.mxu0 }
  0xbc   :  { %v238_v15 = vpop.f32.mrf.mxu1  ;;  %v331_v59 = vpop.f32.mrf.mxu3 }
  0xbd   :  { %v239_v16 = vadd.f32 %v238_v15, %v137_v23 }
  0xbe   :  { %v292_v19 = vpop.f32.mrf.mxu2 }
  0xbf   :  { %v293_v27 = vadd.f32 %v292_v19, %v239_v16 }
  0xc1   :  { %v332_v33 = vadd.f32 %v331_v59, %v293_v27 }
  0xd4   :  { %v400_v60 = vpop.f32.mrf.mxu0 }
  0xd5   :  { %v401_v61 = vadd.f32 %v400_v60, %v332_v33 }
  0xdc   :  { %v437_v2 = vpop.f32.mrf.mxu1 }
  0xdd   :  { %v438_v8 = vadd.f32 %v437_v2, %v401_v61 }
  0xdf   :  { %v1559_v4 = vsub.f32 %v1192_v7, %v438_v8  ;;  %v801_v7 = vsub.f32 1.0, %v800_v14 }
  0xe1   :  { %v441_v21 = vmul.f32 %v1559_v4, %v1559_v4  ;;  %v802_v5 = vmul.f32 %v880_v9, %v801_v7 }
  0xe3   :  { %v490_v34 = vand.u32 4294901760, %v441_v21  ;;  %v803_v47 = vadd.f32 %v880_v9, %v802_v5 }
  0xe5   :  { %v491_v30 = vsub.f32 %v441_v21, %v490_v34  ;;  %596 = vmatmul.f32.vlgmr.msrb.gmra.mxu3 %v490_v34  ;;  %v805_v3 = vsel %vm804_vm0, %v880_v9, %v803_v47 }
  0xe7   :  { %650 = vmatmul.f32.vlgmr.msra.gmra.mxu0 %v491_v30  ;;  %v492_v31 = vand.u32 4294901760, %v491_v30 }
  0xe9   :  { %689 = vmatmul.f32.vlgmr.msra.gmra.mxu1 %v492_v31  ;;  %v493_v38 = vsub.f32 %v491_v30, %v492_v31 }
  0xeb   :  { %v494_v39 = vand.u32 4294901760, %v493_v38 }
  0xed   :  { %495 = vmatmul.f32.vlgmr.msrb.gmra.mxu2 %v494_v39  ;;  %795 = vmatmul.f32.vlgmr.msra.gmra.mxu3 %v490_v34 }
  0xf5   :  { %758 = vmatmul.f32.vlgmr.msra.gmra.mxu2 %v490_v34 }
 0x164   :  { %v651_v57 = vpop.f32.mrf.mxu0 }
 0x166   :  { %v690_v52 = vpop.f32.mrf.mxu1 }
 0x168   :  { %v597_v43 = vpop.f32.mrf.mxu3 }
 0x170   :  { %v496_v10 = vpop.f32.mrf.mxu2  ;;  %v796_v24 = vpop.f32.mrf.mxu3 }
 0x171   :  { %v598_v46 = vadd.f32 %v597_v43, %v496_v10 }
 0x173   :  { %v652_v11 = vadd.f32 %v651_v57, %v598_v46 }
 0x175   :  { %v691_v17 = vadd.f32 %v690_v52, %v652_v11 }
 0x178   :  { %v759_v53 = vpop.f32.mrf.mxu2 }
 0x179   :  { %v760_v50 = vadd.f32 %v759_v53, %v691_v17 }
 0x17b   :  { %v797_v22 = vadd.f32 %v796_v24, %v760_v50 }
 0x17d   :  { %v806_v20 = vmul.f32 %v805_v3, %v797_v22 }
 0x17f   :  { %881 = vrsqrt.f32 %v806_v20  ;;  %vm814_vm1 = vcmp.eq.f32.partialorder %v806_v20, inf  ;;  %v817_v45 = vand.u32 2147483648, %v806_v20  ;;  %vm816_vm2 = vcmp.eq.f32.partialorder %v806_v20, 0.0 }
 0x185   :  { %v882_v29 = vpop.eup %881 }
 0x186   :  { %v808_v55 = vmul.f32 %v882_v29, %v806_v20 }
 0x188   :  { %v809_v44 = vmul.f32 %v882_v29, %v808_v55 }
 0x18a   :  { %v810_v36 = vmul.f32 0.5, %v809_v44 }
 0x18c   :  { %v811_v48 = vsub.f32 1.5, %v810_v36 }
 0x18e   :  { %v812_v62 = vmul.f32 %v882_v29, %v811_v48 }
 0x190   :  { %v813_v58 = vmul.f32 %v812_v62, %v806_v20 }
 0x192   :  { %v815_v42 = vsel %vm814_vm1, %v806_v20, %v813_v58 }
 0x193   :  { %v818_v56 = vsel %vm816_vm2, %v817_v45, %v815_v42 }
 0x194   :  { %v819_v12 = vadd.f32 1e-06, %v818_v56 }
 0x196   :  { %883 = vrcp.f32 %v819_v12  ;;  %v831_v40 = vand.u32 2147483648, %v819_v12  ;;  %v829_v25 = vand.u32 2147483647, %v819_v12  ;;  %vm825_vm4 = vweird.f32 %v819_v12 }
 0x198   :  { %v832_v32 = vor.u32 1.1754944e-38, %v831_v40  ;;  %vm830_vm6 = vcmp.eq.f32.partialorder %v829_v25, 8.507059e+37 }
 0x19c   :  { %v884_v51 = vpop.eup %883 }
 0x19d   :  { %v821_v49 = vmul.f32 %v884_v51, %v819_v12  ;;  %vm826_vm3 = vweird.f32 %v884_v51 }
 0x19e   :  { %vm827_vm5 = vmor %vm825_vm4, %vm826_vm3 }
 0x19f   :  { %v822_v1 = vsub.f32 1.0, %v821_v49 }
 0x1a1   :  { %v823_v54 = vmul.f32 %v884_v51, %v822_v1 }
 0x1a3   :  { %v824_v0 = vadd.f32 %v884_v51, %v823_v54 }
 0x1a5   :  { %v828_v63 = vsel %vm827_vm5, %v884_v51, %v824_v0 }
 0x1a6   :  { %v833_v13 = vsel %vm830_vm6, %v832_v32, %v828_v63 }
 0x1a7   :  { %v835_v6 = vmul.f32 %v833_v13, %v1559_v4 }
 0x1a9   :  { %v839_v26 = vmul.f32 %v877_v28, %v835_v6 }
 0x1ab   :  { %v844_v18 = vadd.f32 %v878_v37, %v839_v26 }
 0x1ad   :  { %845 = vst [vmem:[#allocation10] sm:$0xff] %v844_v18 }
 0x1ae   :  { %849 = vsyncadd [#allocation4], 64  ;;  %s852_s17 = sshll.u32 %s1578_s5, 4  ;;  %s1022_s18 = smov [#allocation10]   ;;  %s853_s17 = int_to_ptr.hbm [resolvable:$true] %s852_s17 }
 0x1af   :  { %s850_s19 = sshll.u32 %s1022_s18, 4  ;;  %s851_s19 = int_to_ptr.vmem [resolvable:$true] %s850_s19 }
 0x1b0   :  { %858 = dma.vmem_to_hbm [thread:$0]  %s851_s19, 64, %s853_s17, [#allocation4], %s1015_s28, %s1015_s28, %s1016_s29  }
 0x1b1   :  { %1011 = dma.done.wait [#allocation4], 128  }
 0x1b2   :  { %1012 = vsyncadd [#allocation4], 4294967168 }
 0x1b3   :  { %863 = vsyncpa [#allocation3], 1 }
 0x1b4   :  { %864 = vsyncpa [#allocation6], 1 }
 0x1b5   :  { %865 = vsyncpa [#allocation9], 1 }
 0x1b6   :  { %866 = vsyncpa [#allocation4], 1 }

</bundles_post_ra>
